<compile_context>
chip_gen: v7x
topology: tpu7x:2x2x1
jax: 0.10.0
libtpu: 0.0.40
codegen_flags: <defaults>
</compile_context>

<pallas_src>
import functools

import jax
import jax.numpy as jnp
from jax import lax
from jax.experimental import pallas as pl
from jax.experimental.pallas import tpu as pltpu


_VMEM_LIMIT = 48 * 1024 * 1024   # explicit scoped-VMEM budget (safe on v5e/v6e/v7x)


def _round_up(x, mult):
    return -(-x // mult) * mult


# ----------------------------- kNN interpolation ------------------------------

def _knn_interp_kernel(pos_ref, pst_ref, bcol_ref, bsrow_ref, xt_ref, y_ref,
                       *, k, npow2):
    n, dim = pos_ref.shape
    mt = pst_ref.shape[1]

    # pairwise squared distances on the VPU (dim is tiny -> a few broadcast
    # passes, no MXU push/pop for a K=3 contraction)
    d = jnp.zeros((n, mt), jnp.float32)
    for dd in range(dim):
        diff = pos_ref[:, dd:dd + 1] - pst_ref[dd:dd + 1, :]
        d = d + diff * diff

    big = jnp.float32(1e30)
    same = bcol_ref[...] == bsrow_ref[...]                      # (N,1)==(1,MT)
    d = jnp.where(same, d, big)

    # pack (distance, row) into ONE monotone int32 key: d >= 0 so its f32 bit
    # pattern is order-preserving; clear the low log2(npow2) mantissa bits and
    # OR in the row index.  Each of the k iterations then does a single
    # min-reduce + one compare (ties broken deterministically by row).
    mask_hi = jnp.int32(~(npow2 - 1))
    rows = lax.broadcasted_iota(jnp.int32, (n, mt), 0)
    key = (pltpu.bitcast(d, jnp.int32) & mask_hi) | rows

    removed = jnp.int32(2 ** 31 - 1)
    w = jnp.zeros((n, mt), jnp.float32)
    for _ in range(k):                        # k is tiny, statically unrolled
        kmin = jnp.min(key, axis=0, keepdims=True)              # (1, MT)
        dmin = pltpu.bitcast(kmin & mask_hi, jnp.float32)
        wt = pl.reciprocal(jnp.maximum(dmin, 1e-16), approx=True)  # 1/d^2 (EUP)
        sel = key == kmin                                       # one row per col
        w = w + jnp.where(sel, wt, 0.0)
        key = jnp.where(sel, removed, key)

    y = jnp.dot(xt_ref[...], w, preferred_element_type=jnp.float32)    # (C, MT)
    wsum = jnp.sum(w, axis=0, keepdims=True)
    y_ref[...] = (y / wsum).astype(y_ref.dtype)    # exact divide for the norm


def knn_interpolate(x, pos, pos_skip, batch, batch_skip, *, k, m_pad, m_tile):
    n, c = x.shape
    m = pos_skip.shape[0]
    dim = pos.shape[1]

    pos_f = pos.astype(jnp.float32)                         # (N, dim)
    pst = jnp.pad(pos_skip.astype(jnp.float32).T, ((0, 0), (0, m_pad - m)))
    bcol = batch.astype(jnp.int32).reshape(n, 1)
    bsrow = jnp.pad(batch_skip.astype(jnp.int32), (0, m_pad - m),
                    constant_values=-1).reshape(1, m_pad)
    xt = x.astype(jnp.float32).T                            # (C, N)

    cost = pl.CostEstimate(
        flops=n * m_pad * (3 * dim + 8 * k) + 2 * c * n * m_pad,
        transcendentals=(k + 1) * m_pad,
        bytes_accessed=4 * (n * dim + dim * m_pad + n + m_pad + c * n
                            + c * m_pad))

    return pl.pallas_call(
        functools.partial(_knn_interp_kernel, k=k, npow2=pl.next_power_of_2(n)),
        out_shape=jax.ShapeDtypeStruct((c, m_pad), jnp.float32),
        grid=(m_pad // m_tile,),
        in_specs=[
            pl.BlockSpec((n, dim), lambda i: (0, 0)),        # coarse positions
            pl.BlockSpec((dim, m_tile), lambda i: (0, i)),   # skip positions^T
            pl.BlockSpec((n, 1), lambda i: (0, 0)),          # batch (coarse)
            pl.BlockSpec((1, m_tile), lambda i: (0, i)),     # batch (skip)
            pl.BlockSpec((c, n), lambda i: (0, 0)),          # x^T
        ],
        out_specs=pl.BlockSpec((c, m_tile), lambda i: (0, i)),
        compiler_params=pltpu.CompilerParams(
            dimension_semantics=("parallel",),
            vmem_limit_bytes=_VMEM_LIMIT),
        cost_estimate=cost,
    )(pos_f, pst, bcol, bsrow, xt)


# ------------------------------ SplineConv layer ------------------------------

def _spline_conv_kernel(src_ref, dst_ref, b_ref, xt_ref, wm_ref, wr_ref,
                        bias_ref, invdeg_ref, out_ref, *, apply_elu):
    ei = pl.program_id(0)
    c_in, m_pad = xt_ref.shape
    c_out = out_ref.shape[0]
    e_tile = src_ref.shape[1]

    @pl.when(ei == 0)
    def _init():
        out_ref[...] = jnp.zeros_like(out_ref)

    # Edge-message pipeline: runs exactly ONCE per edge tile (the output slab
    # covers every node, so there is no per-node-tile recomputation).
    # TODO(synk): for large graphs replace the O(M*E_tile) one-hot gather /
    # scatter with scalar-prefetch / DMA index-driven row gather over
    # dst-sorted edge tiles.
    m_iota = lax.broadcasted_iota(jnp.int32, (m_pad, e_tile), 0)

    # gather source-node features (bf16 one-hot built directly -> exact select)
    gsrc = (m_iota == src_ref[...]).astype(jnp.bfloat16)                # (M, Et)
    xj = jnp.dot(xt_ref[...], gsrc, preferred_element_type=jnp.float32)  # (Ci, Et)

    # fused spline message: ONE MXU matmul over all 125 kernel slots
    #   g[c*C_out + o, e] = sum_w W[w, c, o] * basis[e, w]
    g = jnp.dot(wm_ref[...], b_ref[...],
                preferred_element_type=jnp.float32)                     # (Ci*Co, Et)
    msg = jnp.zeros((c_out, e_tile), jnp.float32)
    for c in range(c_in):                        # short, statically unrolled
        msg = msg + g[c * c_out:(c + 1) * c_out, :] * xj[c:c + 1, :]

    # scatter-add into the full node slab: bf16 one-hot from the lane-dense dst
    # row, bf16 msg operand, f32 accumulation; contraction over the shared
    # edge axis (sc^T, so no (E,1) column layout is ever materialized).
    scT = (m_iota == dst_ref[...]).astype(jnp.bfloat16)                 # (M, Et)
    out_ref[...] += lax.dot_general(
        msg.astype(jnp.bfloat16), scT,
        dimension_numbers=(((1,), (1,)), ((), ())),
        preferred_element_type=jnp.float32)                             # (Co, M)

    @pl.when(ei == pl.num_programs(0) - 1)
    def _finalize():
        root = jnp.dot(wr_ref[...], xt_ref[...],
                       preferred_element_type=jnp.float32)              # (Co, M)
        out = out_ref[...] * invdeg_ref[...] + root + bias_ref[...]
        if apply_elu:
            out = jnp.where(out > 0.0, out,
                            jnp.exp(jnp.minimum(out, 0.0)) - 1.0)       # ELU(a=1)
        out_ref[...] = out


def spline_conv(xt, src_row, dst_row, b_t, w_arr, wr, bias, inv_deg, *,
                e_tile, apply_elu):
    c_in, m_pad = xt.shape
    ks_pad, e_pad = b_t.shape
    ks = w_arr.shape[0]
    c_out = w_arr.shape[2]

    # Wm[c*C_out + o, w] = W[w, c, o]  (operand of the fused message matmul)
    wm = jnp.transpose(w_arr, (1, 2, 0)).reshape(c_in * c_out, ks)
    wm = jnp.pad(wm, ((0, 0), (0, ks_pad - ks)))

    cost = pl.CostEstimate(
        flops=(2 * c_in * m_pad * e_pad + 2 * c_in * c_out * ks_pad * e_pad
               + 2 * c_in * c_out * e_pad + 2 * c_out * m_pad * e_pad
               + 2 * c_out * c_in * m_pad),
        transcendentals=c_out * m_pad,
        bytes_accessed=(e_pad * (8 + 2 * ks_pad) + 2 * c_in * m_pad
                        + 2 * c_in * c_out * ks_pad + 2 * c_out * c_in
                        + 4 * c_out + 4 * m_pad + 4 * c_out * m_pad))

    # TODO(synk): on v7x (2 TensorCores) split the edge axis 2-way with a
    # leading "parallel" grid dim, per-core partial accumulators and a final add.
    return pl.pallas_call(
        functools.partial(_spline_conv_kernel, apply_elu=apply_elu),
        out_shape=jax.ShapeDtypeStruct((c_out, m_pad), jnp.float32),
        grid=(e_pad // e_tile,),
        in_specs=[
            pl.BlockSpec((1, e_tile), lambda j: (0, j)),               # src ids
            pl.BlockSpec((1, e_tile), lambda j: (0, j)),               # dst ids
            pl.BlockSpec((ks_pad, e_tile), lambda j: (0, j)),          # basis^T
            pl.BlockSpec((c_in, m_pad), lambda j: (0, 0)),             # x^T full
            pl.BlockSpec((c_in * c_out, ks_pad), lambda j: (0, 0)),    # Wm
            pl.BlockSpec((c_out, c_in), lambda j: (0, 0)),             # root W^T
            pl.BlockSpec((c_out, 1), lambda j: (0, 0)),                # bias
            pl.BlockSpec((1, m_pad), lambda j: (0, 0)),                # 1/deg
        ],
        out_specs=pl.BlockSpec((c_out, m_pad), lambda j: (0, 0)),
        compiler_params=pltpu.CompilerParams(
            dimension_semantics=("arbitrary",),
            vmem_limit_bytes=_VMEM_LIMIT),
        cost_estimate=cost,
    )(src_row, dst_row, b_t.astype(jnp.bfloat16), xt.astype(jnp.bfloat16),
      wm.astype(jnp.bfloat16), wr.T.astype(jnp.bfloat16),
      bias.astype(jnp.float32).reshape(c_out, 1), inv_deg)


# --------------------------------- glue ---------------------------------------

def spline_basis_dense(pseudo, kernel_size, degree=1):
    """Open B-spline basis (degree 1) -> dense (E, kernel_size**dim) matrix."""
    assert degree == 1
    e, dim = pseudo.shape
    ks_total = kernel_size ** dim
    v = pseudo * (kernel_size - 1)          # open spline, degree 1
    vf = jnp.floor(v)
    frac = v - vf
    vfi = vf.astype(jnp.int32)
    dense = jnp.zeros((e, ks_total), jnp.float32)
    for s in range(2 ** dim):
        wi = jnp.zeros((e,), jnp.int32)
        b = jnp.ones((e,), jnp.float32)
        offset = 1
        for d in range(dim):
            kd = (s >> d) & 1
            # modulo wrap only ever hits a slot whose basis factor is exactly 0
            wi = wi + ((vfi[:, d] + kd) % kernel_size) * offset
            offset *= kernel_size
            b = b * (frac[:, d] if kd == 1 else (1.0 - frac[:, d]))
        dense = dense.at[jnp.arange(e), wi].add(b)
    return dense


def init_params(key, in_channels, hidden_channels, out_channels, dim, n_layers,
                kernel_size):
    ks_total = kernel_size ** dim
    params = []
    for i in range(n_layers):
        c_in = in_channels if i == 0 else hidden_channels
        c_out = out_channels if i == n_layers - 1 else hidden_channels
        key, k1, k2, k3 = jax.random.split(key, 4)
        w = jax.random.normal(k1, (ks_total, c_in, c_out), jnp.float32) * 0.1
        wr = jax.random.normal(k2, (c_in, c_out), jnp.float32) * 0.1
        b = jax.random.normal(k3, (c_out,), jnp.float32) * 0.01
        params.append((w, wr, b))
    return params


def spline_cnn_fp_forward(params, x, pos, batch, x_skip, pos_skip, batch_skip,
                          edge_index, *, patch_size=0.25, kernel_size=5, k=3,
                          drop_act=False):
    n_layers = len(params)
    m = pos_skip.shape[0]
    e = edge_index.shape[1]

    # lane-dense layout: pad skip nodes / edges up to 128-multiples
    m_tile = min(512, _round_up(m, 128))
    m_pad = _round_up(m, m_tile)
    e_tile = min(512, _round_up(e, 128))     # keep wide: MXU N-dim of all matmuls
    e_pad = _round_up(e, e_tile)

    # 1) kNN interpolation of coarse features onto the fine (skip) nodes, (C, M_pad)
    y_t = knn_interpolate(x, pos, pos_skip, batch, batch_skip,
                          k=k, m_pad=m_pad, m_tile=m_tile)

    # 2) pseudo coordinates + open B-spline basis on the real edges (glue)
    src, dst = edge_index[0], edge_index[1]
    pseudo = (pos_skip[dst] - pos_skip[src]) / patch_size + 0.5
    pseudo = jnp.clip(pseudo.astype(jnp.float32), 0.0, 1.0)
    dense_basis = spline_basis_dense(pseudo, kernel_size)          # (E, KS)
    ks = dense_basis.shape[1]
    ks_pad = _round_up(ks, 16)

    # 3) skip concatenation (channel-major)
    if x_skip is not None:
        xs_t = jnp.pad(x_skip.astype(jnp.float32).T, ((0, 0), (0, m_pad - m)))
        xt = jnp.concatenate([y_t, xs_t], axis=0)
    else:
        xt = y_t

    # mean-aggregation normalization (1 / in-degree), shared by all layers
    deg = jnp.zeros((m_pad,), jnp.float32).at[dst].add(1.0)
    inv_deg = (1.0 / jnp.maximum(deg, 1.0)).reshape(1, m_pad)

    # edge arrays padded to a multiple of the edge tile; padded edges carry a
    # zero basis row and dst = -1 so they contribute nothing (both lane-dense)
    src_row = jnp.pad(src.astype(jnp.int32), (0, e_pad - e)).reshape(1, e_pad)
    dst_row = jnp.pad(dst.astype(jnp.int32), (0, e_pad - e),
                      constant_values=-1).reshape(1, e_pad)
    b_t = jnp.pad(dense_basis, ((0, e_pad - e), (0, ks_pad - ks))).T  # (KSp, Ep)

    # 4) SplineConv stack with fused message matmul + ELU
    for i, (w_arr, wr, bias) in enumerate(params):
        apply_elu = not (i == n_layers - 1 and drop_act)
        xt = spline_conv(xt, src_row, dst_row, b_t, w_arr, wr, bias, inv_deg,
                         e_tile=e_tile, apply_elu=apply_elu)

    return xt[:, :m].T, pos_skip, batch_skip


# --------------------------------- main ----------------------------------------

if __name__ == "__main__":
    key = jax.random.PRNGKey(0)

    # small, module-consistent shapes
    B = 2
    n_coarse_per_b, n_fine_per_b = 8, 16
    N = B * n_coarse_per_b            # 16 coarse nodes
    M = B * n_fine_per_b              # 32 fine (skip) nodes
    C_x, C_skip = 8, 8
    in_channels = C_x + C_skip        # 16 (after cat)
    hidden_channels = 16
    out_channels = 8
    dim, kernel_size, n_layers, k, patch_size = 3, 5, 3, 3, 0.25

    keys = jax.random.split(key, 8)
    x = jax.random.normal(keys[0], (N, C_x), jnp.float32)
    pos = jax.random.uniform(keys[1], (N, dim), dtype=jnp.float32)
    x_skip = jax.random.normal(keys[2], (M, C_skip), jnp.float32)
    pos_skip = jax.random.uniform(keys[3], (M, dim), dtype=jnp.float32)
    batch = jnp.repeat(jnp.arange(B, dtype=jnp.int32), n_coarse_per_b)
    batch_skip = jnp.repeat(jnp.arange(B, dtype=jnp.int32), n_fine_per_b)

    # ring-style edges within each batch segment of the skip nodes
    src_list, dst_list = [], []
    for bidx in range(B):
        start = bidx * n_fine_per_b
        for i in range(n_fine_per_b):
            for off in (1, 2):
                j = (i + off) % n_fine_per_b
                src_list.append(start + j)
                dst_list.append(start + i)
    edge_index = jnp.array([src_list, dst_list], dtype=jnp.int32)   # (2, 64)

    params = init_params(keys[4], in_channels, hidden_channels, out_channels,
                         dim, n_layers, kernel_size)

    out, pos_out, batch_out = spline_cnn_fp_forward(
        params, x, pos, batch, x_skip, pos_skip, batch_skip, edge_index,
        patch_size=patch_size, kernel_size=kernel_size, k=k, drop_act=False)
    out = jax.block_until_ready(out)

    assert out.shape == (M, out_channels)
    assert bool(jnp.all(jnp.isfinite(out)))
    print("KERNEL_OK")
</pallas_src>

<mosaic_0001>
module attributes {stable_mosaic.version = 11 : i64} {
  func.func @_knn_interp_kernel(%arg0: i32, %arg1: memref<16x3xf32, #tpu.memory_space<vmem>>, %arg2: memref<3x128xf32, #tpu.memory_space<vmem>>, %arg3: memref<16x1xi32, #tpu.memory_space<vmem>>, %arg4: memref<1x128xi32, #tpu.memory_space<vmem>>, %arg5: memref<8x16xf32, #tpu.memory_space<vmem>>, %arg6: memref<8x128xf32, #tpu.memory_space<vmem>>) attributes {dimension_semantics = [#tpu.dimension_semantics<parallel>], iteration_bounds = array<i64: 1>, scalar_prefetch = 0 : i64, scratch_operands = 0 : i64, tpu.core_type = #tpu.core_type<tc>, window_params = [{pipeline_mode = #tpu.pipeline_mode<synchronous>, transform_indices = @transform_0, window_bounds = array<i64: 16, 3>}, {transform_indices = @transform_1, window_bounds = array<i64: 3, 128>}, {pipeline_mode = #tpu.pipeline_mode<synchronous>, transform_indices = @transform_2, window_bounds = array<i64: 16, 1>}, {transform_indices = @transform_3, window_bounds = array<i64: 1, 128>}, {pipeline_mode = #tpu.pipeline_mode<synchronous>, transform_indices = @transform_4, window_bounds = array<i64: 8, 16>}, {transform_indices = @transform_5, window_bounds = array<i64: 8, 128>}]} {
    %cst = arith.constant 0.000000e+00 : f32
    %0 = vector.broadcast %cst : f32 to vector<16x128xf32>
    %c0 = arith.constant 0 : index
    %c0_0 = arith.constant 0 : index
    %1 = vector.load %arg1[%c0, %c0_0] : memref<16x3xf32, #tpu.memory_space<vmem>>, vector<16x1xf32>
    %c0_1 = arith.constant 0 : index
    %c0_2 = arith.constant 0 : index
    %2 = vector.load %arg2[%c0_1, %c0_2] : memref<3x128xf32, #tpu.memory_space<vmem>>, vector<1x128xf32>
    %3 = vector.broadcast %1 : vector<16x1xf32> to vector<16x128xf32>
    %4 = vector.broadcast %2 : vector<1x128xf32> to vector<16x128xf32>
    %5 = arith.subf %3, %4 : vector<16x128xf32>
    %6 = arith.mulf %5, %5 : vector<16x128xf32>
    %7 = arith.addf %0, %6 : vector<16x128xf32>
    %c0_3 = arith.constant 0 : index
    %c1 = arith.constant 1 : index
    %8 = vector.load %arg1[%c0_3, %c1] : memref<16x3xf32, #tpu.memory_space<vmem>>, vector<16x1xf32>
    %c1_4 = arith.constant 1 : index
    %c0_5 = arith.constant 0 : index
    %9 = vector.load %arg2[%c1_4, %c0_5] : memref<3x128xf32, #tpu.memory_space<vmem>>, vector<1x128xf32>
    %10 = vector.broadcast %8 : vector<16x1xf32> to vector<16x128xf32>
    %11 = vector.broadcast %9 : vector<1x128xf32> to vector<16x128xf32>
    %12 = arith.subf %10, %11 : vector<16x128xf32>
    %13 = arith.mulf %12, %12 : vector<16x128xf32>
    %14 = arith.addf %7, %13 : vector<16x128xf32>
    %c0_6 = arith.constant 0 : index
    %c2 = arith.constant 2 : index
    %15 = vector.load %arg1[%c0_6, %c2] : memref<16x3xf32, #tpu.memory_space<vmem>>, vector<16x1xf32>
    %c2_7 = arith.constant 2 : index
    %c0_8 = arith.constant 0 : index
    %16 = vector.load %arg2[%c2_7, %c0_8] : memref<3x128xf32, #tpu.memory_space<vmem>>, vector<1x128xf32>
    %17 = vector.broadcast %15 : vector<16x1xf32> to vector<16x128xf32>
    %18 = vector.broadcast %16 : vector<1x128xf32> to vector<16x128xf32>
    %19 = arith.subf %17, %18 : vector<16x128xf32>
    %20 = arith.mulf %19, %19 : vector<16x128xf32>
    %21 = arith.addf %14, %20 : vector<16x128xf32>
    %c0_9 = arith.constant 0 : index
    %c0_10 = arith.constant 0 : index
    %22 = vector.load %arg3[%c0_9, %c0_10] : memref<16x1xi32, #tpu.memory_space<vmem>>, vector<16x1xi32>
    %c0_11 = arith.constant 0 : index
    %c0_12 = arith.constant 0 : index
    %23 = vector.load %arg4[%c0_11, %c0_12] : memref<1x128xi32, #tpu.memory_space<vmem>>, vector<1x128xi32>
    %24 = vector.broadcast %22 : vector<16x1xi32> to vector<16x128xi32>
    %25 = vector.broadcast %23 : vector<1x128xi32> to vector<16x128xi32>
    %26 = arith.cmpi eq, %24, %25 : vector<16x128xi32>
    %cst_13 = arith.constant 1.000000e+30 : f32
    %27 = vector.broadcast %cst_13 : f32 to vector<16x128xf32>
    %28 = arith.select %26, %21, %27 : vector<16x128xi1>, vector<16x128xf32>
    %29 = tpu.iota {dimensions = array<i32: 0>} : vector<16x128xi32>
    %30 = tpu.bitcast %28 : vector<16x128xf32> -> vector<16x128xi32>
    %c-16_i32 = arith.constant -16 : i32
    %31 = vector.broadcast %c-16_i32 : i32 to vector<16x128xi32>
    %32 = arith.andi %30, %31 : vector<16x128xi32>
    %33 = arith.ori %32, %29 : vector<16x128xi32>
    %cst_14 = arith.constant 0.000000e+00 : f32
    %34 = vector.broadcast %cst_14 : f32 to vector<16x128xf32>
    %cst_15 = arith.constant dense<2147483647> : vector<128xi32>
    %35 = vector.multi_reduction <minsi>, %33, %cst_15 [0] : vector<16x128xi32> to vector<128xi32>
    %36 = vector.shape_cast %35 : vector<128xi32> to vector<1x128xi32>
    %c-16_i32_16 = arith.constant -16 : i32
    %37 = vector.broadcast %c-16_i32_16 : i32 to vector<1x128xi32>
    %38 = arith.andi %36, %37 : vector<1x128xi32>
    %39 = tpu.bitcast %38 : vector<1x128xi32> -> vector<1x128xf32>
    %cst_17 = arith.constant 1.000000e-16 : f32
    %40 = vector.broadcast %cst_17 : f32 to vector<1x128xf32>
    %41 = arith.maximumf %39, %40 : vector<1x128xf32>
    %42 = tpu.reciprocal %41 {approx = true} : vector<1x128xf32> -> vector<1x128xf32>
    %43 = vector.broadcast %36 : vector<1x128xi32> to vector<16x128xi32>
    %44 = arith.cmpi eq, %33, %43 : vector<16x128xi32>
    %cst_18 = arith.constant 0.000000e+00 : f32
    %45 = vector.shape_cast %42 : vector<1x128xf32> to vector<1x128xf32>
    %46 = vector.broadcast %45 : vector<1x128xf32> to vector<16x128xf32>
    %47 = vector.broadcast %cst_18 : f32 to vector<16x128xf32>
    %48 = arith.select %44, %46, %47 : vector<16x128xi1>, vector<16x128xf32>
    %49 = arith.addf %34, %48 : vector<16x128xf32>
    %c2147483647_i32 = arith.constant 2147483647 : i32
    %50 = vector.broadcast %c2147483647_i32 : i32 to vector<16x128xi32>
    %51 = arith.select %44, %50, %33 : vector<16x128xi1>, vector<16x128xi32>
    %cst_19 = arith.constant dense<2147483647> : vector<128xi32>
    %52 = vector.multi_reduction <minsi>, %51, %cst_19 [0] : vector<16x128xi32> to vector<128xi32>
    %53 = vector.shape_cast %52 : vector<128xi32> to vector<1x128xi32>
    %c-16_i32_20 = arith.constant -16 : i32
    %54 = vector.broadcast %c-16_i32_20 : i32 to vector<1x128xi32>
    %55 = arith.andi %53, %54 : vector<1x128xi32>
    %56 = tpu.bitcast %55 : vector<1x128xi32> -> vector<1x128xf32>
    %cst_21 = arith.constant 1.000000e-16 : f32
    %57 = vector.broadcast %cst_21 : f32 to vector<1x128xf32>
    %58 = arith.maximumf %56, %57 : vector<1x128xf32>
    %59 = tpu.reciprocal %58 {approx = true} : vector<1x128xf32> -> vector<1x128xf32>
    %60 = vector.broadcast %53 : vector<1x128xi32> to vector<16x128xi32>
    %61 = arith.cmpi eq, %51, %60 : vector<16x128xi32>
    %cst_22 = arith.constant 0.000000e+00 : f32
    %62 = vector.shape_cast %59 : vector<1x128xf32> to vector<1x128xf32>
    %63 = vector.broadcast %62 : vector<1x128xf32> to vector<16x128xf32>
    %64 = vector.broadcast %cst_22 : f32 to vector<16x128xf32>
    %65 = arith.select %61, %63, %64 : vector<16x128xi1>, vector<16x128xf32>
    %66 = arith.addf %49, %65 : vector<16x128xf32>
    %c2147483647_i32_23 = arith.constant 2147483647 : i32
    %67 = vector.broadcast %c2147483647_i32_23 : i32 to vector<16x128xi32>
    %68 = arith.select %61, %67, %51 : vector<16x128xi1>, vector<16x128xi32>
    %cst_24 = arith.constant dense<2147483647> : vector<128xi32>
    %69 = vector.multi_reduction <minsi>, %68, %cst_24 [0] : vector<16x128xi32> to vector<128xi32>
    %70 = vector.shape_cast %69 : vector<128xi32> to vector<1x128xi32>
    %c-16_i32_25 = arith.constant -16 : i32
    %71 = vector.broadcast %c-16_i32_25 : i32 to vector<1x128xi32>
    %72 = arith.andi %70, %71 : vector<1x128xi32>
    %73 = tpu.bitcast %72 : vector<1x128xi32> -> vector<1x128xf32>
    %cst_26 = arith.constant 1.000000e-16 : f32
    %74 = vector.broadcast %cst_26 : f32 to vector<1x128xf32>
    %75 = arith.maximumf %73, %74 : vector<1x128xf32>
    %76 = tpu.reciprocal %75 {approx = true} : vector<1x128xf32> -> vector<1x128xf32>
    %77 = vector.broadcast %70 : vector<1x128xi32> to vector<16x128xi32>
    %78 = arith.cmpi eq, %68, %77 : vector<16x128xi32>
    %cst_27 = arith.constant 0.000000e+00 : f32
    %79 = vector.shape_cast %76 : vector<1x128xf32> to vector<1x128xf32>
    %80 = vector.broadcast %79 : vector<1x128xf32> to vector<16x128xf32>
    %81 = vector.broadcast %cst_27 : f32 to vector<16x128xf32>
    %82 = arith.select %78, %80, %81 : vector<16x128xi1>, vector<16x128xf32>
    %83 = arith.addf %66, %82 : vector<16x128xf32>
    %c0_28 = arith.constant 0 : index
    %c0_29 = arith.constant 0 : index
    %84 = vector.load %arg5[%c0_28, %c0_29] : memref<8x16xf32, #tpu.memory_space<vmem>>, vector<8x16xf32>
    %cst_30 = arith.constant dense<0.000000e+00> : vector<8x128xf32>
    %85 = tpu.matmul %84, %83, %cst_30 {dimension_numbers = #tpu.dot_dimension_numbers<[1], [0], [0], [1], [0, 0, 1, 1], [], []>} : vector<8x16xf32>, vector<16x128xf32>, vector<8x128xf32> -> vector<8x128xf32>
    %cst_31 = arith.constant dense<0.000000e+00> : vector<128xf32>
    %86 = vector.multi_reduction <add>, %83, %cst_31 [0] : vector<16x128xf32> to vector<128xf32>
    %87 = vector.shape_cast %86 : vector<128xf32> to vector<1x128xf32>
    %88 = vector.broadcast %87 : vector<1x128xf32> to vector<8x128xf32>
    %89 = arith.divf %85, %88 : vector<8x128xf32>
    %c0_32 = arith.constant 0 : index
    %c0_33 = arith.constant 0 : index
    %90 = vector.load %arg6[%c0_32, %c0_33] : memref<8x128xf32, #tpu.memory_space<vmem>>, vector<8x128xf32>
    tpu.vector_store %arg6[%c0_32, %c0_33], %89 {strides = array<i32>} : memref<8x128xf32, #tpu.memory_space<vmem>>, vector<8x128xf32>,
    return
  }
  func.func @transform_0(%arg0: i32) -> (i32, i32) {
    %c0_i32 = arith.constant 0 : i32
    %c0_i32_0 = arith.constant 0 : i32
    %c0_i32_1 = arith.constant 0 : i32
    return %c0_i32, %c0_i32_0 : i32, i32
  }
  func.func @transform_1(%arg0: i32) -> (i32, i32) {
    %c0_i32 = arith.constant 0 : i32
    %c0_i32_0 = arith.constant 0 : i32
    return %c0_i32, %arg0 : i32, i32
  }
  func.func @transform_2(%arg0: i32) -> (i32, i32) {
    %c0_i32 = arith.constant 0 : i32
    %c0_i32_0 = arith.constant 0 : i32
    %c0_i32_1 = arith.constant 0 : i32
    return %c0_i32, %c0_i32_0 : i32, i32
  }
  func.func @transform_3(%arg0: i32) -> (i32, i32) {
    %c0_i32 = arith.constant 0 : i32
    %c0_i32_0 = arith.constant 0 : i32
    return %c0_i32, %arg0 : i32, i32
  }
  func.func @transform_4(%arg0: i32) -> (i32, i32) {
    %c0_i32 = arith.constant 0 : i32
    %c0_i32_0 = arith.constant 0 : i32
    %c0_i32_1 = arith.constant 0 : i32
    return %c0_i32, %c0_i32_0 : i32, i32
  }
  func.func @transform_5(%arg0: i32) -> (i32, i32) {
    %c0_i32 = arith.constant 0 : i32
    %c0_i32_0 = arith.constant 0 : i32
    return %c0_i32, %arg0 : i32, i32
  }
}

</mosaic_0001>

<bundles_post_ra>
// kernel: tpu_custom_call.1
= control target key start
LH: loop header
LB: loop body
LE: loop exit
PB: predicated region body
PF: predicated region fallthrough
CT: control target
= control target key end

     0   :  { %v337_v1 = vmov 1   ;;  %v338_v2 = vmov 0   ;;  %s421_s0 = inlined_call_operand.vmem [shape: f32[16,3], index: 0, kind: input, shape index: {}]   ;;  %s422_s1 = inlined_call_operand.vmem [shape: f32[3,128], index: 1, kind: input, shape index: {}]   ;;  %s423_s2 = inlined_call_operand.vmem [shape: s32[16,1], index: 2, kind: input, shape index: {}]   ;;  %s424_s3 = inlined_call_operand.vmem [shape: s32[1,128], index: 3, kind: input, shape index: {}]   ;;  %s425_s4 = inlined_call_operand.vmem [shape: f32[8,16], index: 4, kind: input, shape index: {}]   ;;  %s426_s5 = inlined_call_operand.hbm [shape: f32[8,128], index: 5, kind: output, shape index: {}]  }
   0x1   :  { %v21_v0 = vld [vmem:[%s421_s0] sm:$0xff]  ;;  %300 = vset.pattern.permute.xlu1 %v337_v1  ;;  %299 = vset.pattern.permute.xlu0 %v338_v2 }
   0x2   :  { %46 = vperm.xlu1 %300, %v21_v0   ;;  %26 = vperm.xlu0 %299, %v21_v0  }
   0x3   :  { %10 = vsyncpa [#allocation3], 0  ;;  %v22_v3 = vld [vmem:[%s421_s0 + $0x8] sm:$0xff]  ;;  %v339_v4 = vmov 2   ;;  %v82_v5 = vld [vmem:[%s423_s2] sm:$0xff]  ;;  %v340_v7 = vmov 0.0|0.0   ;;  %v99_v20 = vlaneseq }
   0x4   :  { %v83_v6 = vld [vmem:[%s423_s2 + $0x8] sm:$0xff]  ;;  %289 = vmatprep.subr.bf16.mxu0 %v340_v7  ;;  %vm341_vm0 = vmmov 0   ;;  %v342_v8 = vmov 0.0   ;;  %v275_v11 = vld [vmem:[%s422_s1 + $0x1] ss:$0 sm:$0xff]  ;;  %s343_s7 = smov [#allocation2]  }
   0x5   :  { %286 = vmatprep.mubr.msk.f32.mxu0 %vm341_vm0, %v342_v8  ;;  %v274_v12 = vld [vmem:[%s422_s1] ss:$0 sm:$0xff]  ;;  %v276_v19 = vld [vmem:[%s422_s1 + $0x2] ss:$0 sm:$0xff]  ;;  %v100_v29 = vshrl.u32 %v99_v20, 7  ;;  %s266_s8 = sshll.u32 %s343_s7, 4  ;;  %s267_s8 = int_to_ptr.vmem [resolvable:$true] %s266_s8 }
   0x6   :  { %50 = vperm.xlu1 %300, %v22_v3   ;;  %31 = vperm.xlu0 %299, %v22_v3   ;;  %v277_v34 = vld [vmem:[%s424_s3] ss:$0 sm:$0xff]  ;;  %s313_s9 = scalar_lea.vmem %s267_s8, 128  ;;  %p318_p1 = scmp.lt.s32.totalorder %s267_s8, %s267_s8 }
   0x7   :  { %v101_v39 = vadd.s32 8, %v100_v29  ;;  %p314_p0 = scmp.ne.s32.totalorder %s267_s8, %s313_s9  ;;  %p319_p2 = scmp.lt.s32.totalorder %s313_s9, %s313_s9 }
   0x9   :  { %p320_p3 = por %p319_p2, %p318_p1 }
   0xa   :  { %302 = vset.pattern.permute.xlu1 %v339_v4  ;;  %301 = vset.pattern.permute.xlu0 %v339_v4 }
   0xb   :  { %69 = vperm.xlu1 %302, %v22_v3   ;;  %65 = vperm.xlu0 %301, %v21_v0   ;;  %p321_p4 = pnand %p320_p3, %p314_p0 }
   0xf   :  { %303 = vset.pattern.permute.xlu1 %v338_v2  ;;  %304 = vset.pattern.permute.xlu0 %v338_v2 }
  0x10   :  { %86 = vperm.xlu1 %303, %v82_v5   ;;  %89 = vperm.xlu0 %304, %v83_v6  }
  0x81   :  { %v47_v9 = vpop.permute.xlu1 %46  ;;  %v27_v10 = vpop.permute.xlu0 %26 }
  0x82   :  { %v57_v13 = vsub.f32 %v47_v9, %v275_v11  ;;  %v38_v14 = vsub.f32 %v27_v10, %v274_v12 }
  0x84   :  { %v59_v21 = vmul.f32 %v57_v13, %v57_v13  ;;  %v40_v22 = vmul.f32 %v38_v14, %v38_v14 }
  0x85   :  { %v51_v15 = vpop.permute.xlu1 %50  ;;  %v32_v16 = vpop.permute.xlu0 %31 }
  0x86   :  { %v58_v17 = vsub.f32 %v51_v15, %v275_v11  ;;  %v39_v18 = vsub.f32 %v32_v16, %v274_v12  ;;  %v61_v30 = vadd.f32 %v59_v21, %v40_v22 }
  0x88   :  { %v60_v23 = vmul.f32 %v58_v17, %v58_v17  ;;  %v41_v24 = vmul.f32 %v39_v18, %v39_v18 }
  0x8a   :  { %v70_v25 = vpop.permute.xlu1 %69  ;;  %v66_v26 = vpop.permute.xlu0 %65  ;;  %v62_v31 = vadd.f32 %v60_v23, %v41_v24 }
  0x8b   :  { %v77_v27 = vsub.f32 %v70_v25, %v276_v19  ;;  %v76_v28 = vsub.f32 %v66_v26, %v276_v19 }
  0x8d   :  { %v79_v32 = vmul.f32 %v77_v27, %v77_v27  ;;  %v78_v33 = vmul.f32 %v76_v28, %v76_v28  ;;  %v175_v28 = vld [vmem:[%s425_s4] sm:$0xff] }
  0x8f   :  { %v81_v35 = vadd.f32 %v79_v32, %v62_v31  ;;  %v80_v36 = vadd.f32 %v78_v33, %v61_v30  ;;  %v87_v37 = vpop.permute.xlu1 %86  ;;  %v90_v38 = vpop.permute.xlu0 %89 }
  0x90   :  { %vm95_vm1 = vcmp.eq.s32.totalorder %v87_v37, %v277_v34  ;;  %vm96_vm2 = vcmp.eq.s32.totalorder %v90_v38, %v277_v34 }
  0x91   :  { %v97_v40 = vsel %vm95_vm1, %v80_v36, 1e+30  ;;  %v98_v41 = vsel %vm96_vm2, %v81_v35, 1e+30 }
  0x92   :  { %v104_v42 = vand.u32 4294967280, %v97_v40  ;;  %v105_v43 = vand.u32 4294967280, %v98_v41 }
  0x94   :  { %v106_v44 = vor.u32 %v104_v42, %v100_v29  ;;  %v107_v45 = vor.u32 %v105_v43, %v101_v39 }
  0x96   :  { %vm108_vm3 = vcmp.lt.s32.totalorder %v106_v44, %v107_v45 }
  0x97   :  { %v109_v46 = vsel %vm108_vm3, %v106_v44, %v107_v45 }
  0x98   :  { %v110_v47 = vrot.slane %v109_v46, 4 }
  0x9a   :  { %vm111_vm4 = vcmp.lt.s32.totalorder %v109_v46, %v110_v47 }
  0x9b   :  { %v112_v48 = vsel %vm111_vm4, %v109_v46, %v110_v47 }
  0x9c   :  { %v113_v49 = vrot.slane %v112_v48, 2 }
  0x9e   :  { %vm114_vm5 = vcmp.lt.s32.totalorder %v112_v48, %v113_v49 }
  0x9f   :  { %v115_v50 = vsel %vm114_vm5, %v112_v48, %v113_v49  ;;  %vm176_vm5 = vcmask 130048  }
  0xa0   :  { %v116_v51 = vrot.slane %v115_v50, 1 }
  0xa2   :  { %vm117_vm6 = vcmp.lt.s32.totalorder %v115_v50, %v116_v51 }
  0xa3   :  { %v118_v52 = vsel %vm117_vm6, %v115_v50, %v116_v51 }
  0xa4   :  { %vm123_vm7 = vcmp.eq.s32.totalorder %v106_v44, %v118_v52  ;;  %vm124_vm8 = vcmp.eq.s32.totalorder %v107_v45, %v118_v52  ;;  %v119_v4 = vand.u32 4294967280, %v118_v52 }
  0xa5   :  { %v129_v53 = vsel %vm123_vm7, 2147483647, %v106_v44  ;;  %v130_v54 = vsel %vm124_vm8, 2147483647, %v107_v45 }
  0xa6   :  { %vm131_vm9 = vcmp.lt.s32.totalorder %v129_v53, %v130_v54  ;;  %v121_v8 = vmax.f32 %v119_v4, 1e-16 }
  0xa7   :  { %v132_v55 = vsel %vm131_vm9, %v129_v53, %v130_v54 }
  0xa8   :  { %v133_v56 = vrot.slane %v132_v55, 4 }
  0xaa   :  { %vm134_vm10 = vcmp.lt.s32.totalorder %v132_v55, %v133_v56 }
  0xab   :  { %v135_v57 = vsel %vm134_vm10, %v132_v55, %v133_v56 }
  0xac   :  { %v136_v58 = vrot.slane %v135_v57, 2 }
  0xae   :  { %vm137_vm11 = vcmp.lt.s32.totalorder %v135_v57, %v136_v58 }
  0xaf   :  { %v138_v59 = vsel %vm137_vm11, %v135_v57, %v136_v58 }
  0xb0   :  { %v139_v60 = vrot.slane %v138_v59, 1 }
  0xb2   :  { %vm140_vm12 = vcmp.lt.s32.totalorder %v138_v59, %v139_v60 }
  0xb3   :  { %v141_v61 = vsel %vm140_vm12, %v138_v59, %v139_v60 }
  0xb4   :  { %vm146_vm13 = vcmp.eq.s32.totalorder %v129_v53, %v141_v61  ;;  %vm147_vm14 = vcmp.eq.s32.totalorder %v130_v54, %v141_v61  ;;  %v142_v2 = vand.u32 4294967280, %v141_v61 }
  0xb5   :  { %v152_v62 = vsel %vm146_vm13, 2147483647, %v129_v53  ;;  %v153_v63 = vsel %vm147_vm14, 2147483647, %v130_v54 }
  0xb6   :  { %vm154_vm15 = vcmp.lt.s32.totalorder %v152_v62, %v153_v63  ;;  %v144_v6 = vmax.f32 %v142_v2, 1e-16 }
  0xb7   :  { %v155_v0 = vsel %vm154_vm15, %v152_v62, %v153_v63 }
  0xb8   :  { %v156_v1 = vrot.slane %v155_v0, 4  ;;  %305 = vrcp.f32 %v144_v6 }
  0xb9   :  { %307 = vrcp.f32 %v121_v8 }
  0xba   :  { %vm157_vm0 = vcmp.lt.s32.totalorder %v155_v0, %v156_v1 }
  0xbb   :  { %v158_v3 = vsel %vm157_vm0, %v155_v0, %v156_v1 }
  0xbc   :  { %v159_v5 = vrot.slane %v158_v3, 2 }
  0xbe   :  { %vm160_vm1 = vcmp.lt.s32.totalorder %v158_v3, %v159_v5 }
  0xbf   :  { %v161_v7 = vsel %vm160_vm1, %v158_v3, %v159_v5 }
  0xc0   :  { %v162_v9 = vrot.slane %v161_v7, 1 }
  0xc2   :  { %vm163_vm2 = vcmp.lt.s32.totalorder %v161_v7, %v162_v9  ;;  %v306_v13 = vpop.eup %305 }
  0xc3   :  { %v164_v10 = vsel %vm163_vm2, %v161_v7, %v162_v9  ;;  %v308_v14 = vpop.eup %307  ;;  %v148_v15 = vsel %vm146_vm13, %v306_v13, 0.0  ;;  %v149_v16 = vsel %vm147_vm14, %v306_v13, 0.0 }
  0xc4   :  { %v165_v11 = vand.u32 4294967280, %v164_v10  ;;  %v125_v17 = vsel %vm123_vm7, %v308_v14, 0.0  ;;  %v126_v18 = vsel %vm124_vm8, %v308_v14, 0.0  ;;  %vm169_vm3 = vcmp.eq.s32.totalorder %v152_v62, %v164_v10 }
  0xc5   :  { %v150_v20 = vadd.f32 %v148_v15, %v125_v17  ;;  %v151_v21 = vadd.f32 %v149_v16, %v126_v18  ;;  %vm170_vm4 = vcmp.eq.s32.totalorder %v153_v63, %v164_v10 }
  0xc6   :  { %v167_v12 = vmax.f32 %v165_v11, 1e-16 }
  0xc8   :  { %309 = vrcp.f32 %v167_v12 }
  0xd2   :  { %v310_v19 = vpop.eup %309 }
  0xd3   :  { %v171_v22 = vsel %vm169_vm3, %v310_v19, 0.0  ;;  %v172_v23 = vsel %vm170_vm4, %v310_v19, 0.0 }
  0xd4   :  { %v173_v24 = vadd.f32 %v171_v22, %v150_v20  ;;  %v174_v25 = vadd.f32 %v172_v23, %v151_v21 }
  0xd6   :  { %v290_v26 = vpack.c.bf16 %v174_v25, %v173_v24  ;;  %v250_v27 = vadd.f32 %v174_v25, %v173_v24 }
  0xd8   :  { %291 = vmatpush3.bf16.msra.mxu0 %v290_v26  ;;  %v251_v29 = vrot.slane %v250_v27, 4 }
  0xda   :  { %v252_v30 = vadd.f32 %v251_v29, %v250_v27 }
  0xdb   :  { %287 = vmatmul.mubr.msk.f32.vlgmr.msra.gmra.mrb[0].mxu0 %vm176_vm5, %v175_v28 }
  0xdc   :  { %v253_v31 = vrot.slane %v252_v30, 2 }
  0xde   :  { %v254_v32 = vadd.f32 %v253_v31, %v252_v30 }
  0xe0   :  { %v255_v33 = vrot.slane %v254_v32, 1 }
  0xe2   :  { %v256_v34 = vadd.f32 %v255_v33, %v254_v32 }
  0xe4   :  { %311 = vrcp.f32 %v256_v34 }
  0xee   :  { %v312_v35 = vpop.eup %311 }
 0x1ae   :  { %v246_v36 = vpop.f32.mrb[0].mxu0 }
 0x1af   :  { %v258_v37 = vmul.f32 %v312_v35, %v246_v36  ;;  %v288_v38 = vpop.f32.mrb[1].mxu0 }
 0x1b1   :  { %259 = vst [vmem:[#allocation2] sm:$0xff] %v258_v37 }
 0x1b2   :  { %324 = shalt.err (!%p321_p4)
}
 0x1b3   :  { %s325_s11 = scalar_lea.hbm %s426_s5, 128 }
 0x1b4   :  { %p326_p5 = scmp.ne.s32.totalorder %s426_s5, %s325_s11  ;;  %p329_p6 = scmp.lt.u32.totalorder %s325_s11, %s426_s5 }
 0x1b6   :  { %p331_p7 = pnand %p329_p6, %p326_p5 }
 0x1b8   :  { %334 = shalt.err (!%p331_p7)
}
 0x1b9   :  { %269 = dma.vmem_to_hbm [thread:$0]  %s267_s8, 128, %s426_s5, [#allocation3]  }
 0x1ba   :  { %335 = dma.done.wait [#allocation3], 128  }
 0x1bb   :  { %336 = vsyncadd [#allocation3], 4294967168 }
 0x1bc   :  { %273 = vsyncpa [#allocation3], 1 }

</bundles_post_ra>
